<compile_context>
chip_gen: v5e
topology: v5e:2x2
jax: 0.10.0
libtpu: 0.0.40
codegen_flags: <defaults>
</compile_context>

<pallas_src>
import functools

import jax
import jax.numpy as jnp
from jax.experimental import pallas as pl
from jax.experimental.pallas import tpu as pltpu


_TARGET_BLOCK_BYTES = 2 << 20   # ~2 MiB per buffer per grid step (x6 when double-buffered)
_MIN_GRID_STEPS = 8             # target grid steps for pipelining / v7x megacore sharding
_SMALL_TENSOR_BYTES = 1 << 20   # below this, don't force extra steps (overhead-dominated)
_VMEM_LIMIT_BYTES = 32 << 20    # explicit scoped-VMEM limit (safe on v5e/v6e/v7x)


# ----------------------------- Pallas kernels ----------------------------- #

def _glu_kernel(a_ref, b_ref, o_ref):
    # a_ref: (tm, tc) value half, b_ref: (tm, tc) gate half, o_ref: (tm, tc).
    o_ref[...] = a_ref[...] * jax.nn.sigmoid(b_ref[...])


def _glu_fused_row_kernel(half, x_ref, o_ref):
    # x_ref: (tm, K) full flattened sample rows; split into the two halves in-kernel.
    o_ref[...] = x_ref[:, :half] * jax.nn.sigmoid(x_ref[:, half:])


# ----------------------------- tiling policy ----------------------------- #

def _sublane_multiple(itemsize):
    # 8 rows for f32, 16 for bf16, 32 for int8/fp8 (sub-32-bit packs along sublanes).
    return max(8, 32 // itemsize)


def _choose_tiles(N, half, itemsize, min_steps):
    """Pick (tm, tc): tc | half, tc % 128 == 0, per-buffer block <= ~2 MiB, and
    (when the tensor is big enough) >= min_steps grid steps."""
    sub = _sublane_multiple(itemsize)
    h128 = half // 128

    # Column tile: largest multiple of 128 dividing `half` such that `sub` rows of it
    # stay within the per-buffer target.
    cap = max(1, _TARGET_BLOCK_BYTES // (128 * sub * itemsize))
    tc = 128
    for d in range(min(h128, cap), 0, -1):
        if h128 % d == 0:
            tc = d * 128
            break

    # Row tile: fill the per-buffer target (never exceed N; a full-extent row block is
    # exempt from the sublane-multiple rule).
    tm = max(sub, (_TARGET_BLOCK_BYTES // (tc * itemsize)) // sub * sub)
    if tm >= N:
        tm = N

    # Ensure enough grid steps for DMA/compute pipelining (and v7x megacore sharding):
    # first shrink the row tile, then the column tile.
    while tm > sub and pl.cdiv(N, tm) * (half // tc) < min_steps:
        tm = max(sub, (tm // 2) // sub * sub)
    while tc > 128 and pl.cdiv(N, tm) * (half // tc) < min_steps:
        cur = tc // 128
        nxt = 1
        for d in range(cur - 1, 0, -1):
            if h128 % d == 0:
                nxt = d
                break
        tc = nxt * 128
    return tm, tc


# ----------------------------- wrapper ----------------------------- #

def glu(x):
    """GLU over dim 1 of an (N, C, ...) tensor: x[:, :C//2] * sigmoid(x[:, C//2:])."""
    nc = x.shape[1]
    assert nc % 2 == 0, "channels dont divide 2!"
    c = nc // 2
    N = x.shape[0]
    K = 1
    for d in x.shape[1:]:
        K *= d
    half = K // 2
    out_shape = (N, c) + tuple(x.shape[2:])
    itemsize = jnp.dtype(x.dtype).itemsize
    sub = _sublane_multiple(itemsize)

    # Metadata-only reshape; in NCHW the two channel halves are the contiguous column
    # halves of each flattened sample row.
    x2 = x.reshape(N, K)

    total_bytes = N * K * itemsize
    min_steps = _MIN_GRID_STEPS if total_bytes >= _SMALL_TENSOR_BYTES else 1

    if half % 128 == 0:
        # Fast path: lane-dense column halves addressed via two BlockSpecs on x2.
        tm, tc = _choose_tiles(N, half, itemsize, min_steps)
        ncol = half // tc
        out = pl.pallas_call(
            _glu_kernel,
            out_shape=jax.ShapeDtypeStruct((N, half), x.dtype),
            grid=(pl.cdiv(N, tm), ncol),
            in_specs=[
                pl.BlockSpec((tm, tc), lambda i, j: (i, j)),         # value half
                pl.BlockSpec((tm, tc), lambda i, j: (i, j + ncol)),  # gate half
            ],
            out_specs=pl.BlockSpec((tm, tc), lambda i, j: (i, j)),
            compiler_params=pltpu.CompilerParams(
                dimension_semantics=("parallel", "parallel"),
                vmem_limit_bytes=_VMEM_LIMIT_BYTES),
        )(x2, x2)
        return out.reshape(out_shape)

    # Fallback (half not a multiple of 128): one contiguous full-row block per step,
    # split in-kernel.  Full-extent last dims (K for input, half for output) are exempt
    # from the (8,128) BlockSpec rule; no wrapper-side slicing -> no extra HBM traffic.
    per_row_bytes = 2 * (K + half) * itemsize            # double-buffered in + out
    tm = max(sub, ((12 << 20) // max(per_row_bytes, 1)) // sub * sub)
    if tm >= N:
        tm = N
    while tm > sub and pl.cdiv(N, tm) < max(min_steps // 2, 1):
        tm = max(sub, (tm // 2) // sub * sub)
    out = pl.pallas_call(
        functools.partial(_glu_fused_row_kernel, half),
        out_shape=jax.ShapeDtypeStruct((N, half), x.dtype),
        grid=(pl.cdiv(N, tm),),
        in_specs=[pl.BlockSpec((tm, K), lambda i: (i, 0))],
        out_specs=pl.BlockSpec((tm, half), lambda i: (i, 0)),
        compiler_params=pltpu.CompilerParams(
            dimension_semantics=("parallel",),
            vmem_limit_bytes=_VMEM_LIMIT_BYTES),
    )(x2)
    return out.reshape(out_shape)


# ----------------------------- demo / checks ----------------------------- #

def _reference(x):
    c = x.shape[1] // 2
    return x[:, :c] * jax.nn.sigmoid(x[:, c:])


if __name__ == "__main__":
    # 1) Small NCHW example consistent with GLU's use after conv+BN in AttnGAN.
    x1 = jax.random.normal(jax.random.PRNGKey(0), (2, 4, 16, 16), jnp.float32)
    y1 = jax.block_until_ready(glu(x1))
    assert y1.shape == (2, 2, 16, 16), y1.shape
    assert bool(jnp.all(jnp.isfinite(y1)))
    assert bool(jnp.allclose(y1, _reference(x1), atol=1e-6, rtol=1e-6))

    # 2) Slightly larger shape that exercises the multi-step (row x lane) pipelined grid.
    x2 = jax.random.normal(jax.random.PRNGKey(1), (16, 16, 32, 32), jnp.float32)
    y2 = jax.block_until_ready(glu(x2))
    assert y2.shape == (16, 8, 32, 32), y2.shape
    assert bool(jnp.allclose(y2, _reference(x2), atol=1e-6, rtol=1e-6))

    print("KERNEL_OK")
</pallas_src>

<mosaic_0001>
module attributes {stable_mosaic.version = 11 : i64} {
  func.func @_glu_kernel(%arg0: i32, %arg1: i32, %arg2: memref<2x512xf32, #tpu.memory_space<vmem>>, %arg3: memref<2x512xf32, #tpu.memory_space<vmem>>, %arg4: memref<2x512xf32, #tpu.memory_space<vmem>>) attributes {dimension_semantics = [#tpu.dimension_semantics<parallel>, #tpu.dimension_semantics<parallel>], iteration_bounds = array<i64: 1, 1>, scalar_prefetch = 0 : i64, scratch_operands = 0 : i64, tpu.core_type = #tpu.core_type<tc>, window_params = [{transform_indices = @transform_0, window_bounds = array<i64: 2, 512>}, {transform_indices = @transform_1, window_bounds = array<i64: 2, 512>}, {transform_indices = @transform_2, window_bounds = array<i64: 2, 512>}]} {
    %c0 = arith.constant 0 : index
    %c0_0 = arith.constant 0 : index
    %0 = vector.load %arg2[%c0, %c0_0] : memref<2x512xf32, #tpu.memory_space<vmem>>, vector<2x512xf32>
    %c0_1 = arith.constant 0 : index
    %c0_2 = arith.constant 0 : index
    %1 = vector.load %arg3[%c0_1, %c0_2] : memref<2x512xf32, #tpu.memory_space<vmem>>, vector<2x512xf32>
    %2 = arith.negf %1 : vector<2x512xf32>
    %3 = math.exp %2 : vector<2x512xf32>
    %cst = arith.constant 1.000000e+00 : f32
    %4 = vector.broadcast %cst : f32 to vector<2x512xf32>
    %5 = arith.addf %4, %3 : vector<2x512xf32>
    %6 = arith.divf %4, %5 : vector<2x512xf32>
    %7 = arith.mulf %0, %6 : vector<2x512xf32>
    %c0_3 = arith.constant 0 : index
    %c0_4 = arith.constant 0 : index
    %8 = vector.load %arg4[%c0_3, %c0_4] : memref<2x512xf32, #tpu.memory_space<vmem>>, vector<2x512xf32>
    tpu.vector_store %arg4[%c0_3, %c0_4], %7 {strides = array<i32>} : memref<2x512xf32, #tpu.memory_space<vmem>>, vector<2x512xf32>,
    return
  }
  func.func @transform_0(%arg0: i32, %arg1: i32) -> (i32, i32) {
    %c0_i32 = arith.constant 0 : i32
    return %arg0, %arg1 : i32, i32
  }
  func.func @transform_1(%arg0: i32, %arg1: i32) -> (i32, i32) {
    %c1_i32 = arith.constant 1 : i32
    %0 = arith.addi %arg1, %c1_i32 : i32
    %c0_i32 = arith.constant 0 : i32
    return %arg0, %0 : i32, i32
  }
  func.func @transform_2(%arg0: i32, %arg1: i32) -> (i32, i32) {
    %c0_i32 = arith.constant 0 : i32
    return %arg0, %arg1 : i32, i32
  }
}

</mosaic_0001>

<bundles_post_ra>
// kernel: tpu_custom_call.1
= control target key start
LH: loop header
LB: loop body
LE: loop exit
PB: predicated region body
PF: predicated region fallthrough
CT: control target
= control target key end

     0   :  { %7 = vsyncpa [#allocation3], 0  ;;  %s201_s0 = inlined_call_operand.hbm [shape: f32[2,1024], index: 0, kind: input, shape index: {}]   ;;  %s202_s1 = inlined_call_operand.hbm [shape: f32[2,1024], index: 1, kind: input, shape index: {}]   ;;  %s203_s2 = inlined_call_operand.hbm [shape: f32[2,512], index: 2, kind: output, shape index: {}]  }
   0x1   :  { %8 = vsyncpa [#allocation6], 0 }
   0x2   :  { %9 = vsyncpa [#allocation4], 0  ;;  %s15_s11 = sshll.u32 %s201_s0, 4  ;;  %s174_s12 = smov [#allocation2]   ;;  %s16_s11 = int_to_ptr.hbm [resolvable:$true] %s15_s11 }
   0x3   :  { %s17_s13 = sshll.u32 %s174_s12, 4  ;;  %s87_s16 = scalar_lea.hbm %s202_s1, 8  ;;  %s18_s13 = int_to_ptr.vmem [resolvable:$true] %s17_s13 }
   0x4   :  { %20 = dma.hbm_to_vmem [thread:$0]  %s16_s11, 128, %s18_s13, [#allocation3]  }
   0x5   :  { %s30_s17 = sshll.u32 %s87_s16, 4  ;;  %s175_s18 = smov [#allocation5]   ;;  %s31_s17 = int_to_ptr.hbm [resolvable:$true] %s30_s17 }
   0x6   :  { %s32_s19 = sshll.u32 %s175_s18, 4  ;;  %s33_s19 = int_to_ptr.vmem [resolvable:$true] %s32_s19 }
   0x7   :  { %35 = dma.hbm_to_vmem [thread:$0]  %s31_s17, 128, %s33_s19, [#allocation6]  }
   0x8   :  { %168 = dma.done.wait [#allocation3], 128  }
   0x9   :  { %169 = vsyncadd [#allocation3], 4294967168 }
   0xa   :  { %170 = dma.done.wait [#allocation6], 128  }
   0xb   :  { %171 = vsyncadd [#allocation6], 4294967168  ;;  %v47_v0 = vld [vmem:[#allocation5] sm:$0xff]  ;;  %v46_v12 = vld [vmem:[#allocation2] sm:$0xff]  ;;  %s176_s0 = smov [#allocation7]   ;;  %s76_s22 = sshll.u32 %s203_s2, 4  ;;  %s77_s22 = int_to_ptr.hbm [resolvable:$true] %s76_s22 }
   0xc   :  { %v88_v1 = vmul.f32 -1.442695, %v47_v0  ;;  %s74_s1 = sshll.u32 %s176_s0, 4  ;;  %s75_s1 = int_to_ptr.vmem [resolvable:$true] %s74_s1 }
   0xe   :  { %92 = vpow2.f32 %v88_v1 }
  0x14   :  { %v93_v2 = vpop.eup %92 }
  0x15   :  { %v51_v3 = vadd.f32 1.0, %v93_v2 }
  0x17   :  { %94 = vrcp.f32 %v51_v3  ;;  %v63_v6 = vand.u32 2147483648, %v51_v3  ;;  %vm57_vm0 = vweird.f32 %v51_v3  ;;  %v61_v8 = vand.u32 2147483647, %v51_v3 }
  0x19   :  { %v64_v10 = vor.u32 1.1754944e-38, %v63_v6  ;;  %vm62_vm3 = vcmp.eq.f32.partialorder %v61_v8, 8.507059e+37 }
  0x1d   :  { %v95_v4 = vpop.eup %94 }
  0x1e   :  { %v53_v5 = vmul.f32 %v95_v4, %v51_v3  ;;  %vm58_vm1 = vweird.f32 %v95_v4 }
  0x1f   :  { %vm59_vm2 = vmor %vm57_vm0, %vm58_vm1 }
  0x20   :  { %v54_v7 = vsub.f32 1.0, %v53_v5 }
  0x22   :  { %v55_v9 = vmul.f32 %v95_v4, %v54_v7 }
  0x24   :  { %v56_v11 = vadd.f32 %v95_v4, %v55_v9 }
  0x26   :  { %v60_v13 = vsel %vm59_vm2, %v95_v4, %v56_v11 }
  0x27   :  { %v65_v14 = vsel %vm62_vm3, %v64_v10, %v60_v13 }
  0x28   :  { %v67_v15 = vmul.f32 %v65_v14, %v46_v12 }
  0x2a   :  { %68 = vst [vmem:[#allocation7] sm:$0xff] %v67_v15 }
  0x2b   :  { %79 = dma.vmem_to_hbm [thread:$0]  %s75_s1, 128, %s77_s22, [#allocation4]  }
  0x2c   :  { %172 = dma.done.wait [#allocation4], 128  }
  0x2d   :  { %173 = vsyncadd [#allocation4], 4294967168 }
  0x2e   :  { %84 = vsyncpa [#allocation3], 1 }
  0x2f   :  { %85 = vsyncpa [#allocation6], 1 }
  0x30   :  { %86 = vsyncpa [#allocation4], 1 }

</bundles_post_ra>
